<compile_context>
chip_gen: v7x
topology: tpu7x:2x2x1
jax: 0.10.0
libtpu: 0.0.40
codegen_flags: <defaults>
</compile_context>

<pallas_src>
import functools

import jax
import jax.numpy as jnp
from jax.experimental import pallas as pl
from jax.experimental.pallas import tpu as pltpu

_EPS = 1e-5


def _gbn_kernel(x_ref, w_ref, b_ref, o_ref):
    # x_ref: (CPS, vbs, Dt) tile = CPS virtual batches, one D tile.
    x = x_ref[...].astype(jnp.float32)
    inv_n = 1.0 / x.shape[1]

    # One-pass stats: sum and sum-of-squares over the virtual-batch axis.
    s1 = jnp.sum(x, axis=1, keepdims=True)            # (CPS, 1, Dt)
    s2 = jnp.sum(x * x, axis=1, keepdims=True)        # (CPS, 1, Dt)
    mean = s1 * inv_n
    var = jnp.maximum(s2 * inv_n - mean * mean, 0.0)  # biased variance
    inv = jax.lax.rsqrt(var + _EPS)

    gamma = w_ref[...].astype(jnp.float32)            # (1, 1, Dt)
    beta = b_ref[...].astype(jnp.float32)             # (1, 1, Dt)

    # Fold affine into per-(chunk, feature) scale / shift.
    scale = inv * gamma                                # (CPS, 1, Dt)
    shift = beta - mean * scale                        # (CPS, 1, Dt)

    o_ref[...] = (x * scale + shift).astype(o_ref.dtype)


@functools.partial(jax.jit, static_argnames=("virtual_batch_size",))
def gbn_forward(x, weight, bias, *, virtual_batch_size=128):
    """Ghost Batch Norm forward. x: [B, D]; weight/bias: [D]."""
    B, D = x.shape
    vbs = min(virtual_batch_size, B)
    assert B % vbs == 0, "kernel assumes batch divisible by virtual_batch_size"
    num_chunks = B // vbs

    # --- D tiling: lane-dense tiles when D is 128-aligned, else full D. ---
    if D % 128 == 0:
        d_tile = min(D, 1024)
        while D % d_tile != 0:
            d_tile -= 128
    else:
        d_tile = D  # block dim == full array dim satisfies the (8,128) rule

    # --- Pack multiple virtual batches per grid step (~4 MiB f32 blocks). ---
    # Size on the f32 compute footprint so bf16 inputs stay inside VMEM too.
    compute_itemsize = max(jnp.dtype(x.dtype).itemsize, 4)
    target_block_bytes = 4 * 1024 * 1024
    per_chunk_bytes = vbs * d_tile * compute_itemsize
    cps_cap = max(1, target_block_bytes // per_chunk_bytes)
    cps = 1
    for c in range(1, num_chunks + 1):
        if num_chunks % c == 0 and c <= cps_cap:
            cps = c  # largest divisor of num_chunks within the VMEM budget

    x3 = x.reshape(num_chunks, vbs, D)   # free (contiguous) reshape
    w3 = weight.reshape(1, 1, D)
    b3 = bias.reshape(1, 1, D)

    # Chunk-group axis iterates fastest (last) so gamma/beta block indices are
    # constant across the inner loop -> DMA'd once per D tile, kept resident.
    grid = (D // d_tile, num_chunks // cps)

    out = pl.pallas_call(
        _gbn_kernel,
        out_shape=jax.ShapeDtypeStruct((num_chunks, vbs, D), x.dtype),
        grid_spec=pltpu.PrefetchScalarGridSpec(
            num_scalar_prefetch=0,
            grid=grid,
            in_specs=[
                # CPS virtual batches x one D tile.
                pl.BlockSpec((cps, vbs, d_tile), lambda j, i: (i, 0, j)),
                # gamma / beta: block index independent of the inner axis.
                pl.BlockSpec((1, 1, d_tile), lambda j, i: (0, 0, j)),
                pl.BlockSpec((1, 1, d_tile), lambda j, i: (0, 0, j)),
            ],
            out_specs=pl.BlockSpec((cps, vbs, d_tile), lambda j, i: (i, 0, j)),
        ),
        compiler_params=pltpu.CompilerParams(
            # Both axes produce independent output tiles -> megacore-shardable.
            dimension_semantics=("parallel", "parallel"),
            # 2 streamed arrays x 2 buffers x ~4 MiB + elementwise temporaries
            # fits comfortably; 48 MiB also respects v7x's 64 MiB physical VMEM.
            vmem_limit_bytes=48 * 1024 * 1024,
        ),
    )(x3, w3, b3)

    return out.reshape(B, D)


def _gbn_reference(x, weight, bias, virtual_batch_size):
    B, D = x.shape
    vbs = min(virtual_batch_size, B)
    chunks = x.reshape(B // vbs, vbs, D).astype(jnp.float32)
    mean = chunks.mean(axis=1, keepdims=True)
    var = ((chunks - mean) ** 2).mean(axis=1, keepdims=True)
    y = (chunks - mean) * jax.lax.rsqrt(var + _EPS) * weight + bias
    return y.reshape(B, D).astype(x.dtype)


if __name__ == "__main__":
    key = jax.random.PRNGKey(0)
    kx, kw, kb = jax.random.split(key, 3)

    B, D = 16, 32              # batch, input_dim
    virtual_batch_size = 8     # -> 2 virtual batches

    x = jax.random.normal(kx, (B, D), dtype=jnp.float32)
    # BatchNorm1d default init is weight=1, bias=0; perturb deterministically
    # so the affine part is actually exercised.
    weight = 1.0 + 0.1 * jax.random.normal(kw, (D,), dtype=jnp.float32)
    bias = 0.1 * jax.random.normal(kb, (D,), dtype=jnp.float32)

    out = gbn_forward(x, weight, bias, virtual_batch_size=virtual_batch_size)
    out = jax.block_until_ready(out)

    ref = _gbn_reference(x, weight, bias, virtual_batch_size)
    assert out.shape == (B, D)
    assert jnp.allclose(out, ref, atol=1e-5, rtol=1e-5)

    print("KERNEL_OK")
</pallas_src>

<mosaic_0001>
module attributes {stable_mosaic.version = 11 : i64} {
  func.func @_gbn_kernel(%arg0: i32, %arg1: i32, %arg2: memref<2x8x32xf32, #tpu.memory_space<vmem>>, %arg3: memref<1x1x32xf32, #tpu.memory_space<vmem>>, %arg4: memref<1x1x32xf32, #tpu.memory_space<vmem>>, %arg5: memref<2x8x32xf32, #tpu.memory_space<vmem>>) attributes {dimension_semantics = [#tpu.dimension_semantics<parallel>, #tpu.dimension_semantics<parallel>], iteration_bounds = array<i64: 1, 1>, scalar_prefetch = 0 : i64, scratch_operands = 0 : i64, tpu.core_type = #tpu.core_type<tc>, window_params = [{transform_indices = @transform_0, window_bounds = array<i64: 2, 8, 32>}, {transform_indices = @transform_1, window_bounds = array<i64: 1, 1, 32>}, {transform_indices = @transform_2, window_bounds = array<i64: 1, 1, 32>}, {transform_indices = @transform_3, window_bounds = array<i64: 2, 8, 32>}]} {
    %c0 = arith.constant 0 : index
    %c0_0 = arith.constant 0 : index
    %c0_1 = arith.constant 0 : index
    %0 = vector.load %arg2[%c0, %c0_0, %c0_1] : memref<2x8x32xf32, #tpu.memory_space<vmem>>, vector<2x8x32xf32>
    %cst = arith.constant dense<0.000000e+00> : vector<2x32xf32>
    %1 = vector.multi_reduction <add>, %0, %cst [1] : vector<2x8x32xf32> to vector<2x32xf32>
    %2 = vector.shape_cast %1 : vector<2x32xf32> to vector<2x1x32xf32>
    %3 = arith.mulf %0, %0 : vector<2x8x32xf32>
    %cst_2 = arith.constant dense<0.000000e+00> : vector<2x32xf32>
    %4 = vector.multi_reduction <add>, %3, %cst_2 [1] : vector<2x8x32xf32> to vector<2x32xf32>
    %5 = vector.shape_cast %4 : vector<2x32xf32> to vector<2x1x32xf32>
    %cst_3 = arith.constant 1.250000e-01 : f32
    %6 = vector.broadcast %cst_3 : f32 to vector<2x1x32xf32>
    %7 = arith.mulf %2, %6 : vector<2x1x32xf32>
    %cst_4 = arith.constant 1.250000e-01 : f32
    %8 = vector.broadcast %cst_4 : f32 to vector<2x1x32xf32>
    %9 = arith.mulf %5, %8 : vector<2x1x32xf32>
    %10 = arith.mulf %7, %7 : vector<2x1x32xf32>
    %11 = arith.subf %9, %10 : vector<2x1x32xf32>
    %cst_5 = arith.constant 0.000000e+00 : f32
    %12 = vector.broadcast %cst_5 : f32 to vector<2x1x32xf32>
    %13 = arith.maximumf %11, %12 : vector<2x1x32xf32>
    %cst_6 = arith.constant 9.99999974E-6 : f32
    %14 = vector.broadcast %cst_6 : f32 to vector<2x1x32xf32>
    %15 = arith.addf %13, %14 : vector<2x1x32xf32>
    %16 = math.rsqrt %15 : vector<2x1x32xf32>
    %c0_7 = arith.constant 0 : index
    %c0_8 = arith.constant 0 : index
    %c0_9 = arith.constant 0 : index
    %17 = vector.load %arg3[%c0_7, %c0_8, %c0_9] : memref<1x1x32xf32, #tpu.memory_space<vmem>>, vector<1x1x32xf32>
    %c0_10 = arith.constant 0 : index
    %c0_11 = arith.constant 0 : index
    %c0_12 = arith.constant 0 : index
    %18 = vector.load %arg4[%c0_10, %c0_11, %c0_12] : memref<1x1x32xf32, #tpu.memory_space<vmem>>, vector<1x1x32xf32>
    %19 = vector.broadcast %17 : vector<1x1x32xf32> to vector<2x1x32xf32>
    %20 = arith.mulf %16, %19 : vector<2x1x32xf32>
    %21 = arith.mulf %7, %20 : vector<2x1x32xf32>
    %22 = vector.broadcast %18 : vector<1x1x32xf32> to vector<2x1x32xf32>
    %23 = arith.subf %22, %21 : vector<2x1x32xf32>
    %24 = vector.broadcast %20 : vector<2x1x32xf32> to vector<2x8x32xf32>
    %25 = arith.mulf %0, %24 : vector<2x8x32xf32>
    %26 = vector.broadcast %23 : vector<2x1x32xf32> to vector<2x8x32xf32>
    %27 = arith.addf %25, %26 : vector<2x8x32xf32>
    %c0_13 = arith.constant 0 : index
    %c0_14 = arith.constant 0 : index
    %c0_15 = arith.constant 0 : index
    %28 = vector.load %arg5[%c0_13, %c0_14, %c0_15] : memref<2x8x32xf32, #tpu.memory_space<vmem>>, vector<2x8x32xf32>
    tpu.vector_store %arg5[%c0_13, %c0_14, %c0_15], %27 {strides = array<i32>} : memref<2x8x32xf32, #tpu.memory_space<vmem>>, vector<2x8x32xf32>,
    return
  }
  func.func @transform_0(%arg0: i32, %arg1: i32) -> (i32, i32, i32) {
    %c0_i32 = arith.constant 0 : i32
    %c0_i32_0 = arith.constant 0 : i32
    return %arg1, %c0_i32, %arg0 : i32, i32, i32
  }
  func.func @transform_1(%arg0: i32, %arg1: i32) -> (i32, i32, i32) {
    %c0_i32 = arith.constant 0 : i32
    %c0_i32_0 = arith.constant 0 : i32
    %c0_i32_1 = arith.constant 0 : i32
    return %c0_i32, %c0_i32_0, %arg0 : i32, i32, i32
  }
  func.func @transform_2(%arg0: i32, %arg1: i32) -> (i32, i32, i32) {
    %c0_i32 = arith.constant 0 : i32
    %c0_i32_0 = arith.constant 0 : i32
    %c0_i32_1 = arith.constant 0 : i32
    return %c0_i32, %c0_i32_0, %arg0 : i32, i32, i32
  }
  func.func @transform_3(%arg0: i32, %arg1: i32) -> (i32, i32, i32) {
    %c0_i32 = arith.constant 0 : i32
    %c0_i32_0 = arith.constant 0 : i32
    return %arg1, %c0_i32, %arg0 : i32, i32, i32
  }
}

</mosaic_0001>

<bundles_post_ra>
// kernel: gbn_forward.1
= control target key start
LH: loop header
LB: loop body
LE: loop exit
PB: predicated region body
PF: predicated region fallthrough
CT: control target
= control target key end

     0   :  { %8 = vsyncpa [#allocation3], 0  ;;  %s249_s0 = inlined_call_operand.hbm [shape: f32[2,8,32], index: 0, kind: input, shape index: {}]   ;;  %s250_s1 = inlined_call_operand.vmem [shape: f32[1,1,32], index: 1, kind: input, shape index: {}]   ;;  %s251_s2 = inlined_call_operand.vmem [shape: f32[1,1,32], index: 2, kind: input, shape index: {}]   ;;  %s252_s3 = inlined_call_operand.hbm [shape: f32[2,8,32], index: 3, kind: output, shape index: {}]  }
   0x1   :  { %9 = vsyncpa [#allocation4], 0  ;;  %s183_s12 = smov [#allocation2]   ;;  %s135_s16 = scalar_lea.hbm %s249_s0, 256 }
   0x2   :  { %s15_s13 = sshll.u32 %s183_s12, 4  ;;  %p136_p0 = scmp.ne.s32.totalorder %s249_s0, %s135_s16  ;;  %s16_s13 = int_to_ptr.vmem [resolvable:$true] %s15_s13 }
   0x3   :  { %p139_p1 = scmp.lt.u32.totalorder %s135_s16, %s249_s0 }
   0x5   :  { %p141_p2 = pnand %p139_p1, %p136_p0 }
   0x7   :  { %144 = shalt.err (!%p141_p2)
}
   0x8   :  { %s145_s21 = scalar_lea.vmem %s16_s13, 256  ;;  %p150_p4 = scmp.lt.s32.totalorder %s16_s13, %s16_s13 }
   0x9   :  { %p146_p3 = scmp.ne.s32.totalorder %s16_s13, %s145_s21  ;;  %p151_p5 = scmp.lt.s32.totalorder %s145_s21, %s145_s21 }
   0xb   :  { %p152_p6 = por %p151_p5, %p150_p4 }
   0xd   :  { %p153_p7 = pnand %p152_p6, %p146_p3 }
   0xf   :  { %156 = shalt.err (!%p153_p7)
}
  0x10   :  { %s184_s22 = smov 128   ;;  %s185_s23 = smov 8  }
  0x11   :  { %21 = dma.hbm_to_vmem [thread:$0]  %s249_s0, 256, %s16_s13, [#allocation3], %s184_s22, %s184_s22, %s185_s23  }
  0x12   :  { %179 = dma.done.wait [#allocation3], 256  }
  0x13   :  { %180 = vsyncadd [#allocation3], 4294967040  ;;  %vm31_vm0 = vcmask 261120   ;;  %v29_v0 = vld [vmem:[#allocation2] sm:$0xff]  ;;  %v30_v3 = vld [vmem:[#allocation2 + $0x8] sm:$0xff]  ;;  %v84_v44 = vlaneseq  ;;  %s186_s29 = smov [#allocation5]  }
  0x14   :  { %v32_v1 = vsel %vm31_vm0, %v29_v0, 0.0  ;;  %v46_v2 = vmul.f32 %v29_v0, %v29_v0  ;;  %v39_v5 = vsel %vm31_vm0, %v30_v3, 0.0  ;;  %v47_v6 = vmul.f32 %v30_v3, %v30_v3  ;;  %v76_v46 = vld [vmem:[%s250_s1] sm:$0x1]  ;;  %s115_s1 = sshll.u32 %s186_s29, 4  ;;  %s116_s1 = int_to_ptr.vmem [resolvable:$true] %s115_s1 }
  0x15   :  { %v33_v4 = vrot.slane %v32_v1, 4  ;;  %v40_v8 = vrot.slane %v39_v5, 4  ;;  %v85_v45 = vshrl.u32 %v84_v44, 7  ;;  %v77_v51 = vld [vmem:[%s251_s2] sm:$0x1]  ;;  %s157_s2 = scalar_lea.vmem %s116_s1, 256  ;;  %p162_p9 = scmp.lt.s32.totalorder %s116_s1, %s116_s1 }
  0x16   :  { %v48_v7 = vsel %vm31_vm0, %v46_v2, 0.0  ;;  %v55_v11 = vsel %vm31_vm0, %v47_v6, 0.0  ;;  %p158_p8 = scmp.ne.s32.totalorder %s116_s1, %s157_s2  ;;  %p163_p10 = scmp.lt.s32.totalorder %s157_s2, %s157_s2 }
  0x17   :  { %v34_v9 = vadd.f32 %v33_v4, %v32_v1  ;;  %v49_v10 = vrot.slane %v48_v7, 4  ;;  %v41_v12 = vadd.f32 %v40_v8, %v39_v5  ;;  %v56_v13 = vrot.slane %v55_v11, 4 }
  0x18   :  { %v86_v47 = vsub.s32 0, %v85_v45  ;;  %p164_p11 = por %p163_p10, %p162_p9 }
  0x19   :  { %v35_v14 = vrot.slane %v34_v9, 2  ;;  %v50_v15 = vadd.f32 %v49_v10, %v48_v7  ;;  %v42_v16 = vrot.slane %v41_v12, 2  ;;  %v57_v17 = vadd.f32 %v56_v13, %v55_v11 }
  0x1a   :  { %p165_p12 = pnand %p164_p11, %p158_p8 }
  0x1b   :  { %v36_v18 = vadd.f32 %v35_v14, %v34_v9  ;;  %v51_v19 = vrot.slane %v50_v15, 2  ;;  %v43_v20 = vadd.f32 %v42_v16, %v41_v12  ;;  %v58_v21 = vrot.slane %v57_v17, 2 }
  0x1d   :  { %v37_v22 = vrot.slane %v36_v18, 1  ;;  %v52_v23 = vadd.f32 %v51_v19, %v50_v15  ;;  %v44_v24 = vrot.slane %v43_v20, 1  ;;  %v59_v25 = vadd.f32 %v58_v21, %v57_v17 }
  0x1f   :  { %v38_v26 = vadd.f32 %v37_v22, %v36_v18  ;;  %v53_v27 = vrot.slane %v52_v23, 1  ;;  %v45_v28 = vadd.f32 %v44_v24, %v43_v20  ;;  %v60_v29 = vrot.slane %v59_v25, 1 }
  0x21   :  { %v54_v30 = vadd.f32 %v53_v27, %v52_v23  ;;  %v62_v31 = vmul.f32 0.125, %v38_v26  ;;  %v61_v32 = vadd.f32 %v60_v29, %v59_v25  ;;  %v63_v33 = vmul.f32 0.125, %v45_v28 }
  0x23   :  { %v64_v34 = vmul.f32 0.125, %v54_v30  ;;  %v66_v35 = vmul.f32 %v62_v31, %v62_v31  ;;  %v65_v36 = vmul.f32 0.125, %v61_v32  ;;  %v67_v37 = vmul.f32 %v63_v33, %v63_v33 }
  0x25   :  { %v68_v38 = vsub.f32 %v64_v34, %v66_v35  ;;  %v69_v39 = vsub.f32 %v65_v36, %v67_v37 }
  0x27   :  { %v70_v40 = vmax.f32 %v68_v38, 0.0  ;;  %v71_v41 = vmax.f32 %v69_v39, 0.0 }
  0x29   :  { %v72_v42 = vadd.f32 1e-05, %v70_v40  ;;  %v73_v43 = vadd.f32 1e-05, %v71_v41 }
  0x2b   :  { %131 = vrsqrt.f32 %v72_v42 }
  0x2c   :  { %133 = vrsqrt.f32 %v73_v43 }
  0x35   :  { %v132_v48 = vpop.eup %131 }
  0x36   :  { %v134_v49 = vpop.eup %133  ;;  %v78_v50 = vmul.f32 %v132_v48, %v76_v46 }
  0x37   :  { %v79_v52 = vmul.f32 %v134_v49, %v76_v46 }
  0x38   :  { %v80_v53 = vmul.f32 %v78_v50, %v62_v31  ;;  %v87_v54 = vrot.slane %v78_v50, %v86_v47 }
  0x39   :  { %v81_v55 = vmul.f32 %v79_v52, %v63_v33  ;;  %v91_v56 = vrot.slane %v79_v52, %v86_v47 }
  0x3a   :  { %v82_v57 = vsub.f32 %v77_v51, %v80_v53  ;;  %v92_v58 = vmul.f32 %v87_v54, %v29_v0 }
  0x3b   :  { %v83_v59 = vsub.f32 %v77_v51, %v81_v55  ;;  %v93_v60 = vmul.f32 %v91_v56, %v30_v3 }
  0x3c   :  { %v99_v61 = vrot.slane %v82_v57, %v86_v47 }
  0x3d   :  { %v103_v62 = vrot.slane %v83_v59, %v86_v47 }
  0x3e   :  { %v106_v63 = vadd.f32 %v99_v61, %v92_v58 }
  0x3f   :  { %v107_v1 = vadd.f32 %v103_v62, %v93_v60 }
  0x40   :  { %108 = vst.msk [vmem:[#allocation5] sm:$0xff] %vm31_vm0, %v106_v63 }
  0x41   :  { %109 = vst.msk [vmem:[#allocation5 + $0x8] sm:$0xff] %vm31_vm0, %v107_v1 }
  0x42   :  { %168 = shalt.err (!%p165_p12)
}
  0x43   :  { %s169_s5 = scalar_lea.hbm %s252_s3, 256 }
  0x44   :  { %p170_p13 = scmp.ne.s32.totalorder %s252_s3, %s169_s5  ;;  %p173_p0 = scmp.lt.u32.totalorder %s169_s5, %s252_s3 }
  0x46   :  { %p175_p1 = pnand %p173_p0, %p170_p13 }
  0x48   :  { %178 = shalt.err (!%p175_p1)
}
  0x49   :  { %121 = dma.vmem_to_hbm [thread:$0]  %s116_s1, 256, %s252_s3, [#allocation4], %s184_s22, %s184_s22, %s185_s23  }
  0x4a   :  { %181 = dma.done.wait [#allocation4], 256  }
  0x4b   :  { %182 = vsyncadd [#allocation4], 4294967040 }
  0x4c   :  { %125 = vsyncpa [#allocation3], 1 }
  0x4d   :  { %126 = vsyncpa [#allocation4], 1 }

</bundles_post_ra>
